<compile_context>
chip_gen: v6e
topology: v6e:2x2x1
jax: 0.10.0
libtpu: 0.0.40
codegen_flags: <defaults>
</compile_context>

<pallas_src>
import functools

import jax
import jax.numpy as jnp
from jax import lax
from jax.experimental import pallas as pl
from jax.experimental.pallas import tpu as pltpu


def _toeplitz_weights_fused(w_oihw, W, dtype=jnp.bfloat16):
    """(Cout, Cin, 3, 3) PyTorch weights -> (3*W*Cin, W*Cout) fused block-Toeplitz matrix.

    For dy tap `dy`: mat[dy*W*Cin + (w+dx-1)*Cin + ci, w*Cout + co] = w[co, ci, dy, dx]
    (zero when w+dx-1 is out of range), so one whole conv (padding=1 along W and the channel
    contraction folded in, dy taps stacked along K) is a single matmul against the padded rows.
    """
    Cout, Cin, _, _ = w_oihw.shape
    wk = jnp.transpose(w_oihw, (2, 3, 1, 0))  # (dy, dx, Cin, Cout)
    mats = []
    for dy in range(3):
        big = jnp.zeros((W, Cin, W, Cout), w_oihw.dtype)
        for dx in range(3):
            w_out = [wo for wo in range(W) if 0 <= wo + dx - 1 < W]
            w_in = [wo + dx - 1 for wo in w_out]
            big = big.at[jnp.array(w_in), :, jnp.array(w_out), :].add(wk[dy, dx])
        mats.append(big.reshape(W * Cin, W * Cout))
    return jnp.concatenate(mats, axis=0).astype(dtype)  # (3*W*Cin, W*Cout)


def prepare_double_conv_params(w1, b1, w2, b2, W):
    """Build (once per parameter set) the fused Toeplitz weights + lane-tiled biases."""
    Cout = w1.shape[0]
    WCo = W * Cout
    return dict(
        w1=_toeplitz_weights_fused(w1, W),                      # (3*W*Cin, W*Cout) bf16
        b1=jnp.tile(b1.astype(jnp.float32), W).reshape(1, WCo),  # (1, W*Cout) f32
        w2=_toeplitz_weights_fused(w2, W),                      # (3*W*Cout, W*Cout) bf16
        b2=jnp.tile(b2.astype(jnp.float32), W).reshape(1, WCo),
    )


def _double_conv_kernel(x_ref, w1_ref, b1_ref, w2_ref, b2_ref, o_ref,
                        xp_ref, h1_ref, *, Nb, H):
    # x_ref : (Nb, H, W*Cin)       bf16 lane-dense rows
    # w1_ref: (3*W*Cin, W*Cout)    bf16 fused block-Toeplitz conv1 weights
    # b1_ref: (1, W*Cout)          f32 bias tiled along W
    # w2_ref: (3*W*Cout, W*Cout)   bf16 fused block-Toeplitz conv2 weights
    # b2_ref: (1, W*Cout)          f32
    # o_ref : (Nb, H, W*Cout)      f32 output (lane-dense, 128 lanes)
    # xp_ref: (Nb, H+2, W*Cin)     bf16 VMEM scratch: input + zeroed 1-row halos
    # h1_ref: (Nb, H+2, W*Cout)    bf16 VMEM scratch: hidden activation + halos
    WCi = x_ref.shape[-1]
    WCo = o_ref.shape[-1]

    # ---- H zero-padding fused in-kernel: only the two halo rows are zeroed ----
    xp_ref[:, 0:1, :] = jnp.zeros((Nb, 1, WCi), xp_ref.dtype)
    xp_ref[:, H + 1:H + 2, :] = jnp.zeros((Nb, 1, WCi), xp_ref.dtype)
    xp_ref[:, 1:H + 1, :] = x_ref[...]

    # ---- conv1 + ReLU: ONE MXU matmul, K = 3*W*Cin (dy taps folded into K) ----
    a1 = jnp.concatenate(
        [xp_ref[:, dy:dy + H, :].reshape(Nb * H, WCi) for dy in range(3)], axis=-1)
    acc1 = jnp.dot(a1, w1_ref[...], preferred_element_type=jnp.float32)
    h1 = jnp.maximum(acc1 + b1_ref[...], 0.0)           # f32 epilogue (v5e: no bf16 VPU)

    # hidden activation -> bf16 lane-dense scratch with 1-row halos (written once)
    h1_ref[:, 0:1, :] = jnp.zeros((Nb, 1, WCo), h1_ref.dtype)
    h1_ref[:, H + 1:H + 2, :] = jnp.zeros((Nb, 1, WCo), h1_ref.dtype)
    h1_ref[:, 1:H + 1, :] = h1.reshape(Nb, H, WCo).astype(h1_ref.dtype)

    # ---- conv2 + ReLU: ONE MXU matmul, K = 3*W*Cout ----
    a2 = jnp.concatenate(
        [h1_ref[:, dy:dy + H, :].reshape(Nb * H, WCo) for dy in range(3)], axis=-1)
    acc2 = jnp.dot(a2, w2_ref[...], preferred_element_type=jnp.float32)
    o_ref[...] = jnp.maximum(acc2 + b2_ref[...], 0.0).reshape(Nb, H, WCo).astype(o_ref.dtype)


def _default_batch_block(N, H):
    """Fill the MXU M dimension (Nb*H rows per push) while keeping >=2 grid steps on v7x."""
    try:
        kind = jax.devices()[0].device_kind.lower()
    except Exception:
        kind = ""
    two_tc = "v7" in kind  # v7x: 2 TensorCores/chip -> need grid length >= 2 to use both
    best = 1
    for d in range(1, N + 1):
        if N % d:
            continue
        if d * H > 512:                       # keep the per-step block modest
            continue
        if two_tc and N >= 2 and N // d < 2:  # keep both TCs busy
            continue
        best = d
    return best


def double_conv_pallas(x_nchw, params, *, batch_block=None):
    """x_nchw: (N, Cin, H, W); params from prepare_double_conv_params."""
    N, Cin, H, W = x_nchw.shape
    WCo = params["b1"].shape[-1]
    Cout = WCo // W
    WCi = W * Cin
    Nb = batch_block if batch_block is not None else _default_batch_block(N, H)
    assert N % Nb == 0, "batch_block must divide N"

    # Lane-dense bf16 activation layout (N, H, W*Cin); bf16 cast done once here so the
    # kernel DMAs half the bytes and never re-casts per dy slice.
    x_rows = jnp.transpose(x_nchw, (0, 2, 3, 1)).reshape(N, H, WCi).astype(jnp.bfloat16)

    kernel = functools.partial(_double_conv_kernel, Nb=Nb, H=H)

    flops = 2 * 9 * N * H * W * Cout * (Cin + Cout)
    bytes_accessed = (N * H * WCi * 2 + N * H * WCo * 4
                      + int(params["w1"].size) * 2 + int(params["w2"].size) * 2
                      + 2 * WCo * 4)

    out_rows = pl.pallas_call(
        kernel,
        out_shape=jax.ShapeDtypeStruct((N, H, WCo), jnp.float32),
        grid_spec=pltpu.PrefetchScalarGridSpec(
            num_scalar_prefetch=0,
            grid=(N // Nb,),
            in_specs=[
                pl.BlockSpec((Nb, H, WCi), lambda n: (n, 0, 0)),
                pl.BlockSpec((3 * WCi, WCo), lambda n: (0, 0)),
                pl.BlockSpec((1, WCo), lambda n: (0, 0)),
                pl.BlockSpec((3 * WCo, WCo), lambda n: (0, 0)),
                pl.BlockSpec((1, WCo), lambda n: (0, 0)),
            ],
            out_specs=pl.BlockSpec((Nb, H, WCo), lambda n: (n, 0, 0)),
            scratch_shapes=[
                pltpu.VMEM((Nb, H + 2, WCi), jnp.bfloat16),   # padded input rows
                pltpu.VMEM((Nb, H + 2, WCo), jnp.bfloat16),   # padded hidden activation
            ],
        ),
        compiler_params=pltpu.CompilerParams(dimension_semantics=("parallel",)),
        cost_estimate=pl.CostEstimate(flops=flops, transcendentals=0,
                                      bytes_accessed=bytes_accessed),
    )(x_rows, params["w1"], params["b1"], params["w2"], params["b2"])

    # Back to PyTorch NCHW convention (model-boundary transpose only).
    return jnp.transpose(out_rows.reshape(N, H, W, Cout), (0, 3, 1, 2))


def _reference_double_conv(x_nchw, w1, b1, w2, b2):
    """Pure-JAX reference matching the kernel's bf16-operand / f32-accumulate numerics."""
    f32 = jnp.float32
    xb = x_nchw.astype(jnp.bfloat16).astype(f32)
    w1b = w1.astype(jnp.bfloat16).astype(f32)
    w2b = w2.astype(jnp.bfloat16).astype(f32)
    dn = lax.conv_dimension_numbers(x_nchw.shape, w1.shape, ("NCHW", "OIHW", "NCHW"))
    y = lax.conv_general_dilated(xb, w1b, (1, 1), ((1, 1), (1, 1)),
                                 dimension_numbers=dn, precision=lax.Precision.HIGHEST)
    y = jax.nn.relu(y + b1.reshape(1, -1, 1, 1))
    yb = y.astype(jnp.bfloat16).astype(f32)
    dn2 = lax.conv_dimension_numbers(y.shape, w2.shape, ("NCHW", "OIHW", "NCHW"))
    y = lax.conv_general_dilated(yb, w2b, (1, 1), ((1, 1), (1, 1)),
                                 dimension_numbers=dn2, precision=lax.Precision.HIGHEST)
    y = jax.nn.relu(y + b2.reshape(1, -1, 1, 1))
    return y


if __name__ == "__main__":
    # Small shapes consistent with the module's forward.
    N, Cin, Cout, H, W = 2, 4, 8, 16, 16

    key = jax.random.PRNGKey(0)
    k_x, k_w1, k_b1, k_w2, k_b2 = jax.random.split(key, 5)

    x = jax.random.normal(k_x, (N, Cin, H, W), dtype=jnp.float32)

    # Deterministic PyTorch-like init: U(-bound, bound), bound = 1/sqrt(fan_in).
    bound1 = 1.0 / jnp.sqrt(Cin * 9.0)
    bound2 = 1.0 / jnp.sqrt(Cout * 9.0)
    w1 = jax.random.uniform(k_w1, (Cout, Cin, 3, 3), jnp.float32, -bound1, bound1)
    b1 = jax.random.uniform(k_b1, (Cout,), jnp.float32, -bound1, bound1)
    w2 = jax.random.uniform(k_w2, (Cout, Cout, 3, 3), jnp.float32, -bound2, bound2)
    b2 = jax.random.uniform(k_b2, (Cout,), jnp.float32, -bound2, bound2)

    # Toeplitz weights built ONCE and reused across forward calls.
    params = jax.tree.map(jax.block_until_ready, prepare_double_conv_params(w1, b1, w2, b2, W))

    out = jax.block_until_ready(double_conv_pallas(x, params))
    ref = jax.block_until_ready(_reference_double_conv(x, w1, b1, w2, b2))

    assert out.shape == (N, Cout, H, W), out.shape
    assert jnp.allclose(out, ref, atol=5e-3, rtol=5e-3), float(jnp.max(jnp.abs(out - ref)))

    print("KERNEL_OK")
</pallas_src>

<mosaic_0001>
module attributes {stable_mosaic.version = 11 : i64} {
  func.func @_double_conv_kernel(%arg0: i32, %arg1: memref<2x16x64xbf16, #tpu.memory_space<vmem>>, %arg2: memref<192x128xbf16, #tpu.memory_space<vmem>>, %arg3: memref<1x128xf32, #tpu.memory_space<vmem>>, %arg4: memref<384x128xbf16, #tpu.memory_space<vmem>>, %arg5: memref<1x128xf32, #tpu.memory_space<vmem>>, %arg6: memref<2x16x128xf32, #tpu.memory_space<vmem>>, %arg7: memref<2x18x64xbf16, #tpu.memory_space<vmem>>, %arg8: memref<2x18x128xbf16, #tpu.memory_space<vmem>>) attributes {dimension_semantics = [#tpu.dimension_semantics<parallel>], iteration_bounds = array<i64: 1>, scalar_prefetch = 0 : i64, scratch_operands = 2 : i64, tpu.core_type = #tpu.core_type<tc>, window_params = [{transform_indices = @transform_0, window_bounds = array<i64: 2, 16, 64>}, {pipeline_mode = #tpu.pipeline_mode<synchronous>, transform_indices = @transform_1, window_bounds = array<i64: 192, 128>}, {pipeline_mode = #tpu.pipeline_mode<synchronous>, transform_indices = @transform_2, window_bounds = array<i64: 1, 128>}, {pipeline_mode = #tpu.pipeline_mode<synchronous>, transform_indices = @transform_3, window_bounds = array<i64: 384, 128>}, {pipeline_mode = #tpu.pipeline_mode<synchronous>, transform_indices = @transform_4, window_bounds = array<i64: 1, 128>}, {transform_indices = @transform_5, window_bounds = array<i64: 2, 16, 128>}]} {
    %cst = arith.constant 0.000000e+00 : bf16
    %0 = vector.broadcast %cst : bf16 to vector<2x1x64xbf16>
    %c0 = arith.constant 0 : index
    %c0_0 = arith.constant 0 : index
    %c0_1 = arith.constant 0 : index
    %1 = vector.load %arg7[%c0, %c0_0, %c0_1] : memref<2x18x64xbf16, #tpu.memory_space<vmem>>, vector<2x1x64xbf16>
    tpu.vector_store %arg7[%c0, %c0_0, %c0_1], %0 {strides = array<i32>} : memref<2x18x64xbf16, #tpu.memory_space<vmem>>, vector<2x1x64xbf16>,
    %cst_2 = arith.constant 0.000000e+00 : bf16
    %2 = vector.broadcast %cst_2 : bf16 to vector<2x1x64xbf16>
    %c0_3 = arith.constant 0 : index
    %c17 = arith.constant 17 : index
    %c0_4 = arith.constant 0 : index
    %3 = vector.load %arg7[%c0_3, %c17, %c0_4] : memref<2x18x64xbf16, #tpu.memory_space<vmem>>, vector<2x1x64xbf16>
    tpu.vector_store %arg7[%c0_3, %c17, %c0_4], %2 {strides = array<i32>} : memref<2x18x64xbf16, #tpu.memory_space<vmem>>, vector<2x1x64xbf16>,
    %c0_5 = arith.constant 0 : index
    %c0_6 = arith.constant 0 : index
    %c0_7 = arith.constant 0 : index
    %4 = vector.load %arg1[%c0_5, %c0_6, %c0_7] : memref<2x16x64xbf16, #tpu.memory_space<vmem>>, vector<2x16x64xbf16>
    %c0_8 = arith.constant 0 : index
    %c1 = arith.constant 1 : index
    %c0_9 = arith.constant 0 : index
    %5 = vector.load %arg7[%c0_8, %c1, %c0_9] : memref<2x18x64xbf16, #tpu.memory_space<vmem>>, vector<2x16x64xbf16>
    tpu.vector_store %arg7[%c0_8, %c1, %c0_9], %4 {strides = array<i32>} : memref<2x18x64xbf16, #tpu.memory_space<vmem>>, vector<2x16x64xbf16>,
    %c0_10 = arith.constant 0 : index
    %c0_11 = arith.constant 0 : index
    %c0_12 = arith.constant 0 : index
    %6 = vector.load %arg7[%c0_10, %c0_11, %c0_12] : memref<2x18x64xbf16, #tpu.memory_space<vmem>>, vector<2x16x64xbf16>
    %7 = vector.shape_cast %6 : vector<2x16x64xbf16> to vector<32x64xbf16>
    %c0_13 = arith.constant 0 : index
    %c1_14 = arith.constant 1 : index
    %c0_15 = arith.constant 0 : index
    %8 = vector.load %arg7[%c0_13, %c1_14, %c0_15] : memref<2x18x64xbf16, #tpu.memory_space<vmem>>, vector<2x16x64xbf16>
    %9 = vector.shape_cast %8 : vector<2x16x64xbf16> to vector<32x64xbf16>
    %c0_16 = arith.constant 0 : index
    %c2 = arith.constant 2 : index
    %c0_17 = arith.constant 0 : index
    %10 = vector.load %arg7[%c0_16, %c2, %c0_17] : memref<2x18x64xbf16, #tpu.memory_space<vmem>>, vector<2x16x64xbf16>
    %11 = vector.shape_cast %10 : vector<2x16x64xbf16> to vector<32x64xbf16>
    %12 = tpu.concatenate %7, %9, %11 in 1 : vector<32x64xbf16>, vector<32x64xbf16>, vector<32x64xbf16> -> vector<32x192xbf16>
    %c0_18 = arith.constant 0 : index
    %c0_19 = arith.constant 0 : index
    %13 = vector.load %arg2[%c0_18, %c0_19] : memref<192x128xbf16, #tpu.memory_space<vmem>>, vector<192x128xbf16>
    %cst_20 = arith.constant dense<0.000000e+00> : vector<32x128xf32>
    %14 = tpu.matmul %12, %13, %cst_20 {dimension_numbers = #tpu.dot_dimension_numbers<[1], [0], [0], [1], [0, 0, 1, 1], [], []>} : vector<32x192xbf16>, vector<192x128xbf16>, vector<32x128xf32> -> vector<32x128xf32>
    %c0_21 = arith.constant 0 : index
    %c0_22 = arith.constant 0 : index
    %15 = vector.load %arg3[%c0_21, %c0_22] : memref<1x128xf32, #tpu.memory_space<vmem>>, vector<1x128xf32>
    %16 = vector.broadcast %15 : vector<1x128xf32> to vector<32x128xf32>
    %17 = arith.addf %14, %16 : vector<32x128xf32>
    %cst_23 = arith.constant 0.000000e+00 : f32
    %18 = vector.broadcast %cst_23 : f32 to vector<32x128xf32>
    %19 = arith.maximumf %17, %18 : vector<32x128xf32>
    %cst_24 = arith.constant 0.000000e+00 : bf16
    %20 = vector.broadcast %cst_24 : bf16 to vector<2x1x128xbf16>
    %c0_25 = arith.constant 0 : index
    %c0_26 = arith.constant 0 : index
    %c0_27 = arith.constant 0 : index
    %21 = vector.load %arg8[%c0_25, %c0_26, %c0_27] : memref<2x18x128xbf16, #tpu.memory_space<vmem>>, vector<2x1x128xbf16>
    tpu.vector_store %arg8[%c0_25, %c0_26, %c0_27], %20 {strides = array<i32>} : memref<2x18x128xbf16, #tpu.memory_space<vmem>>, vector<2x1x128xbf16>,
    %cst_28 = arith.constant 0.000000e+00 : bf16
    %22 = vector.broadcast %cst_28 : bf16 to vector<2x1x128xbf16>
    %c0_29 = arith.constant 0 : index
    %c17_30 = arith.constant 17 : index
    %c0_31 = arith.constant 0 : index
    %23 = vector.load %arg8[%c0_29, %c17_30, %c0_31] : memref<2x18x128xbf16, #tpu.memory_space<vmem>>, vector<2x1x128xbf16>
    tpu.vector_store %arg8[%c0_29, %c17_30, %c0_31], %22 {strides = array<i32>} : memref<2x18x128xbf16, #tpu.memory_space<vmem>>, vector<2x1x128xbf16>,
    %24 = vector.shape_cast %19 : vector<32x128xf32> to vector<2x16x128xf32>
    %25 = arith.truncf %24 : vector<2x16x128xf32> to vector<2x16x128xbf16>
    %c0_32 = arith.constant 0 : index
    %c1_33 = arith.constant 1 : index
    %c0_34 = arith.constant 0 : index
    %26 = vector.load %arg8[%c0_32, %c1_33, %c0_34] : memref<2x18x128xbf16, #tpu.memory_space<vmem>>, vector<2x16x128xbf16>
    tpu.vector_store %arg8[%c0_32, %c1_33, %c0_34], %25 {strides = array<i32>} : memref<2x18x128xbf16, #tpu.memory_space<vmem>>, vector<2x16x128xbf16>,
    %c0_35 = arith.constant 0 : index
    %c0_36 = arith.constant 0 : index
    %c0_37 = arith.constant 0 : index
    %27 = vector.load %arg8[%c0_35, %c0_36, %c0_37] : memref<2x18x128xbf16, #tpu.memory_space<vmem>>, vector<2x16x128xbf16>
    %28 = vector.shape_cast %27 : vector<2x16x128xbf16> to vector<32x128xbf16>
    %c0_38 = arith.constant 0 : index
    %c1_39 = arith.constant 1 : index
    %c0_40 = arith.constant 0 : index
    %29 = vector.load %arg8[%c0_38, %c1_39, %c0_40] : memref<2x18x128xbf16, #tpu.memory_space<vmem>>, vector<2x16x128xbf16>
    %30 = vector.shape_cast %29 : vector<2x16x128xbf16> to vector<32x128xbf16>
    %c0_41 = arith.constant 0 : index
    %c2_42 = arith.constant 2 : index
    %c0_43 = arith.constant 0 : index
    %31 = vector.load %arg8[%c0_41, %c2_42, %c0_43] : memref<2x18x128xbf16, #tpu.memory_space<vmem>>, vector<2x16x128xbf16>
    %32 = vector.shape_cast %31 : vector<2x16x128xbf16> to vector<32x128xbf16>
    %33 = tpu.concatenate %28, %30, %32 in 1 : vector<32x128xbf16>, vector<32x128xbf16>, vector<32x128xbf16> -> vector<32x384xbf16>
    %c0_44 = arith.constant 0 : index
    %c0_45 = arith.constant 0 : index
    %34 = vector.load %arg4[%c0_44, %c0_45] : memref<384x128xbf16, #tpu.memory_space<vmem>>, vector<384x128xbf16>
    %cst_46 = arith.constant dense<0.000000e+00> : vector<32x128xf32>
    %35 = tpu.matmul %33, %34, %cst_46 {dimension_numbers = #tpu.dot_dimension_numbers<[1], [0], [0], [1], [0, 0, 1, 1], [], []>} : vector<32x384xbf16>, vector<384x128xbf16>, vector<32x128xf32> -> vector<32x128xf32>
    %c0_47 = arith.constant 0 : index
    %c0_48 = arith.constant 0 : index
    %36 = vector.load %arg5[%c0_47, %c0_48] : memref<1x128xf32, #tpu.memory_space<vmem>>, vector<1x128xf32>
    %37 = vector.broadcast %36 : vector<1x128xf32> to vector<32x128xf32>
    %38 = arith.addf %35, %37 : vector<32x128xf32>
    %cst_49 = arith.constant 0.000000e+00 : f32
    %39 = vector.broadcast %cst_49 : f32 to vector<32x128xf32>
    %40 = arith.maximumf %38, %39 : vector<32x128xf32>
    %41 = vector.shape_cast %40 : vector<32x128xf32> to vector<2x16x128xf32>
    %c0_50 = arith.constant 0 : index
    %c0_51 = arith.constant 0 : index
    %c0_52 = arith.constant 0 : index
    %42 = vector.load %arg6[%c0_50, %c0_51, %c0_52] : memref<2x16x128xf32, #tpu.memory_space<vmem>>, vector<2x16x128xf32>
    tpu.vector_store %arg6[%c0_50, %c0_51, %c0_52], %41 {strides = array<i32>} : memref<2x16x128xf32, #tpu.memory_space<vmem>>, vector<2x16x128xf32>,
    return
  }
  func.func @transform_0(%arg0: i32) -> (i32, i32, i32) {
    %c0_i32 = arith.constant 0 : i32
    %c0_i32_0 = arith.constant 0 : i32
    %c0_i32_1 = arith.constant 0 : i32
    return %arg0, %c0_i32, %c0_i32_0 : i32, i32, i32
  }
  func.func @transform_1(%arg0: i32) -> (i32, i32) {
    %c0_i32 = arith.constant 0 : i32
    %c0_i32_0 = arith.constant 0 : i32
    %c0_i32_1 = arith.constant 0 : i32
    return %c0_i32, %c0_i32_0 : i32, i32
  }
  func.func @transform_2(%arg0: i32) -> (i32, i32) {
    %c0_i32 = arith.constant 0 : i32
    %c0_i32_0 = arith.constant 0 : i32
    %c0_i32_1 = arith.constant 0 : i32
    return %c0_i32, %c0_i32_0 : i32, i32
  }
  func.func @transform_3(%arg0: i32) -> (i32, i32) {
    %c0_i32 = arith.constant 0 : i32
    %c0_i32_0 = arith.constant 0 : i32
    %c0_i32_1 = arith.constant 0 : i32
    return %c0_i32, %c0_i32_0 : i32, i32
  }
  func.func @transform_4(%arg0: i32) -> (i32, i32) {
    %c0_i32 = arith.constant 0 : i32
    %c0_i32_0 = arith.constant 0 : i32
    %c0_i32_1 = arith.constant 0 : i32
    return %c0_i32, %c0_i32_0 : i32, i32
  }
  func.func @transform_5(%arg0: i32) -> (i32, i32, i32) {
    %c0_i32 = arith.constant 0 : i32
    %c0_i32_0 = arith.constant 0 : i32
    %c0_i32_1 = arith.constant 0 : i32
    return %arg0, %c0_i32, %c0_i32_0 : i32, i32, i32
  }
}

</mosaic_0001>

<bundles_post_ra>
// kernel: tpu_custom_call.1
= control target key start
LH: loop header
LB: loop body
LE: loop exit
PB: predicated region body
PF: predicated region fallthrough
CT: control target
= control target key end

     0   :  { %10 = vsyncpa [#allocation5], 0  ;;  %s1417_s0 = inlined_call_operand.hbm [shape: bf16[2,16,64], index: 0, kind: input, shape index: {}]   ;;  %s1418_s1 = inlined_call_operand.hbm [shape: bf16[192,128], index: 1, kind: input, shape index: {}]   ;;  %s1419_s2 = inlined_call_operand.vmem [shape: f32[1,128], index: 2, kind: input, shape index: {}]   ;;  %s1420_s3 = inlined_call_operand.hbm [shape: bf16[384,128], index: 3, kind: input, shape index: {}]   ;;  %s1421_s4 = inlined_call_operand.vmem [shape: f32[1,128], index: 4, kind: input, shape index: {}]   ;;  %s1422_s5 = inlined_call_operand.hbm [shape: f32[2,16,128], index: 5, kind: output, shape index: {}]  }
   0x1   :  { %11 = vsyncpa [#allocation8], 0 }
   0x2   :  { %12 = vsyncpa [#allocation6], 0  ;;  %s1184_s18 = smov [#allocation7]   ;;  %s1185_s20 = smov [#allocation4]  }
   0x3   :  { %s30_s19 = sshll.u32 %s1184_s18, 4  ;;  %s18_s21 = sshll.u32 %s1185_s20, 4  ;;  %s31_s19 = int_to_ptr.vmem [resolvable:$true] %s30_s19  ;;  %s19_s21 = int_to_ptr.vmem [resolvable:$true] %s18_s21 }
   0x4   :  { %s1106_s22 = scalar_lea.vmem %s31_s19, 1536  ;;  %p1111_p1 = scmp.lt.s32.totalorder %s31_s19, %s31_s19 }
   0x5   :  { %p1107_p0 = scmp.ne.s32.totalorder %s31_s19, %s1106_s22  ;;  %p1112_p2 = scmp.lt.s32.totalorder %s1106_s22, %s1106_s22 }
   0x7   :  { %p1113_p3 = por %p1112_p2, %p1111_p1 }
   0x9   :  { %p1114_p4 = pnand %p1113_p3, %p1107_p0 }
   0xb   :  { %1117 = shalt.err (!%p1114_p4)
}
   0xc   :  { %s1186_s23 = smov 64   ;;  %s1187_s24 = smov 4  }
   0xd   :  { %36 = dma.hbm_to_vmem [thread:$0]  %s1418_s1, 1536, %s31_s19, [#allocation8], %s1186_s23, %s1186_s23, %s1187_s24  }
   0xe   :  { %s1126_s27 = scalar_lea.vmem %s19_s21, 256  ;;  %p1131_p6 = scmp.lt.s32.totalorder %s19_s21, %s19_s21 }
   0xf   :  { %p1127_p5 = scmp.ne.s32.totalorder %s19_s21, %s1126_s27  ;;  %p1132_p7 = scmp.lt.s32.totalorder %s1126_s27, %s1126_s27 }
  0x11   :  { %p1133_p8 = por %p1132_p7, %p1131_p6 }
  0x13   :  { %p1134_p9 = pnand %p1133_p8, %p1127_p5 }
  0x15   :  { %1137 = shalt.err (!%p1134_p9)
}
  0x16   :  { %24 = dma.hbm_to_vmem [thread:$0]  %s1417_s0, 256, %s19_s21, [#allocation5], %s1186_s23, %s1186_s23, %s1187_s24  }
  0x17   :  { %s1188_s30 = smov [#allocation9]  }
  0x18   :  { %s44_s6 = sshll.u32 %s1188_s30, 4  ;;  %s45_s6 = int_to_ptr.vmem [resolvable:$true] %s44_s6 }
  0x19   :  { %s1146_s7 = scalar_lea.vmem %s45_s6, 3072  ;;  %p1151_p11 = scmp.lt.s32.totalorder %s45_s6, %s45_s6 }
  0x1a   :  { %p1147_p10 = scmp.ne.s32.totalorder %s45_s6, %s1146_s7  ;;  %p1152_p12 = scmp.lt.s32.totalorder %s1146_s7, %s1146_s7 }
  0x1c   :  { %p1153_p13 = por %p1152_p12, %p1151_p11 }
  0x1e   :  { %p1154_p0 = pnand %p1153_p13, %p1147_p10 }
  0x20   :  { %1157 = shalt.err (!%p1154_p0)
}
  0x21   :  { %50 = dma.hbm_to_vmem [thread:$0]  %s1420_s3, 3072, %s45_s6, [#allocation8], %s1186_s23, %s1186_s23, %s1187_s24  }
  0x22   :  { %1178 = dma.done.wait [#allocation5], 256  }
  0x23   :  { %1179 = vsyncadd [#allocation5], 4294967040 }
  0x24   :  { %1180 = dma.done.wait [#allocation8], 4608  }
  0x25   :  { %1181 = vsyncadd [#allocation8], 4294962688  ;;  %vm63_vm0 = vcmask 516096   ;;  %vm64_vm1 = vsmask.f32 256  ;;  %v1189_v0 = vmov 0  }
  0x26   :  { %vm72_vm2 = vsmask.f32 7938  ;;  %367 = vmatprep.subr.bf16.mxu0 %v1189_v0  ;;  %vm1240_vm3 = vmand %vm63_vm0, %vm64_vm1  ;;  %vm84_vm5 = vsmask.f32 4368  ;;  %vm126_vm6 = vcmask 519168   ;;  %v1059_v10 = vld [vmem:[#allocation7 + $0x38] sm:$0xff]  }
  0x27   :  { %vm1245_vm4 = vmand %vm63_vm0, %vm72_vm2  ;;  %v66_v3 = vld [vmem:[#allocation2] sm:$0x1]  ;;  %v69_v4 = vld [vmem:[#allocation2 + $0xc] sm:$0x1]  ;;  %368 = vmatpush1.bf16.msra.mxu0 %v1059_v10  ;;  %vm149_vm9 = vsmask.f32 3328 }
  0x28   :  { %v74_v5 = vld [vmem:[#allocation2 + $0x8] sm:$0x1]  ;;  %v67_v6 = vsel %vm1240_vm3, 0, %v66_v3  ;;  %v70_v7 = vsel %vm1240_vm3, 0, %v69_v4  ;;  %v80_v9 = vld [vmem:[#allocation4] sm:$0xf]  ;;  %369 = vmatprep.subr.bf16.mxu0 %v1189_v0  ;;  %vm1260_vm7 = vmor %vm64_vm1, %vm84_vm5 }
  0x29   :  { %v75_v8 = vsel %vm1245_vm4, 0, %v74_v5  ;;  %68 = vst [vmem:[#allocation2] sm:$0x1] %v67_v6  ;;  %71 = vst [vmem:[#allocation2 + $0xc] sm:$0x1] %v70_v7  ;;  %v87_v13 = vshrl.u32 %v80_v9, 16 }
  0x2a   :  { %76 = vst [vmem:[#allocation2 + $0x8] sm:$0x1] %v75_v8  ;;  %v81_v11 = vld [vmem:[#allocation4 + $0x4] sm:$0xf]  ;;  %v82_v12 = vld [vmem:[#allocation4 + $0x8] sm:$0xf]  ;;  %vm1266_vm8 = vmand %vm126_vm6, %vm72_vm2 }
  0x2b   :  { %v90_v14 = vshll.u32 %v80_v9, 16  ;;  %v95_v15 = vshrl.u32 %v81_v11, 16  ;;  %v98_v16 = vshll.u32 %v81_v11, 16  ;;  %v104_v17 = vshrl.u32 %v82_v12, 16  ;;  %v77_v19 = vld [vmem:[#allocation2 + $0x14] sm:$0x1] }
  0x2c   :  { %v107_v18 = vshll.u32 %v82_v12, 16  ;;  %v89_v20 = vrot.slane %v87_v13, 7  ;;  %v78_v21 = vsel %vm1245_vm4, 0, %v77_v19  ;;  %v83_v22 = vld [vmem:[#allocation4 + $0xc] sm:$0xf]  ;;  %v1060_v30 = vld [vmem:[#allocation7 + $0x30] sm:$0xff]  }
  0x2d   :  { %v97_v24 = vrot.slane %v95_v15, 7  ;;  %v106_v25 = vrot.slane %v104_v17, 7  ;;  %79 = vst [vmem:[#allocation2 + $0x14] sm:$0x1] %v78_v21  ;;  %v112_v26 = vshrl.u32 %v83_v22, 16  ;;  %v115_v27 = vshll.u32 %v83_v22, 16  ;;  %370 = vmatpush1.bf16.msra.mxu0 %v1060_v30 }
  0x2e   :  { %v92_v28 = vor.u32 %v90_v14, %v89_v20  ;;  %v93_v29 = vrot.slane %v89_v20, 4  ;;  %v1061_v37 = vld [vmem:[#allocation7 + $0x28] sm:$0xff]   ;;  %371 = vmatprep.subr.bf16.mxu0 %v1189_v0  ;;  %v1062_v49 = vld [vmem:[#allocation7 + $0x20] sm:$0xff]   ;;  %vm150_vm10 = vsmask.f32 7440  ;;  %v1063_v51 = vld [vmem:[#allocation7 + $0x18] sm:$0xff]  }
  0x2f   :  { %v100_v31 = vor.u32 %v98_v16, %v97_v24  ;;  %v102_v32 = vrot.slane %v97_v24, 4  ;;  %v109_v33 = vor.u32 %v107_v18, %v106_v25  ;;  %v110_v35 = vrot.slane %v106_v25, 4  ;;  %v1064_v61 = vld [vmem:[#allocation7 + $0x10] sm:$0xff]   ;;  %vm1308_vm14 = vmor %vm149_vm9, %vm150_vm10  ;;  %v1065_v22 = vld [vmem:[#allocation7 + $0x8] sm:$0xff]   ;;  %s1190_s10 = smov [#allocation10]  }
  0x30   :  { %v114_v36 = vrot.slane %v112_v26, 7  ;;  %v128_v39 = vld [vmem:[#allocation2] sm:$0xf]  ;;  %v136_v41 = vld [vmem:[#allocation2 + $0xc] sm:$0xf]  ;;  %vm208_vm11 = vcmask 1042432  }
  0x31   :  { %v101_v38 = vsel %vm1260_vm7, %v93_v29, %v100_v31  ;;  %v133_v40 = vld [vmem:[#allocation2 + $0x8] sm:$0x1]  ;;  %v129_v42 = vsel %vm1266_vm8, %v92_v28, %v128_v39  ;;  %v137_v44 = vsel %vm1266_vm8, %v109_v33, %v136_v41  ;;  %372 = vmatpush1.bf16.msra.mxu0 %v1061_v37  ;;  %vm209_vm12 = vcmask 1046532   ;;  %v1094_v14 = vld [vmem:[#allocation9 + $0x98] sm:$0xff]   ;;  %s915_s11 = sshll.u32 %s1190_s10, 4  ;;  %s916_s11 = int_to_ptr.vmem [resolvable:$true] %s915_s11 }
  0x32   :  { %132 = vst.msk [vmem:[#allocation2 + $0x4] sm:$0xf] %vm126_vm6, %v101_v38  ;;  %v134_v43 = vsel %vm1240_vm3, %v102_v32, %v133_v40  ;;  %v117_v45 = vor.u32 %v115_v27, %v114_v36  ;;  %130 = vst [vmem:[#allocation2] sm:$0xf] %v129_v42  ;;  %v119_v46 = vrot.slane %v114_v36, 4  ;;  %373 = vmatprep.subr.bf16.mxu0 %v1189_v0  ;;  %vm249_vm13 = vcmask 523264   ;;  %p1163_p2 = scmp.lt.s32.totalorder %s916_s11, %s916_s11 }
  0x33   :  { %135 = vst [vmem:[#allocation2 + $0x8] sm:$0x1] %v134_v43  ;;  %138 = vst [vmem:[#allocation2 + $0xc] sm:$0xf] %v137_v44  ;;  %v1066_v43 = vld [vmem:[#allocation7] sm:$0xff]   ;;  %vm420_vm0 = vcmask 1040384  }
  0x34   :  { %v118_v47 = vsel %vm1260_vm7, %v110_v35, %v117_v45  ;;  %v140_v48 = vld [vmem:[#allocation2 + $0x14] sm:$0x1]  ;;  %vm1314_vm15 = vmor %vm208_vm11, %vm209_vm12 }
  0x35   :  { %139 = vst.msk [vmem:[#allocation2 + $0x10] sm:$0xf] %vm126_vm6, %v118_v47  ;;  %v141_v50 = vsel %vm1240_vm3, %v119_v46, %v140_v48  ;;  %374 = vmatpush1.bf16.msra.mxu0 %v1062_v49  ;;  %vm1354_vm3 = vmand %vm420_vm0, %vm64_vm1  ;;  %vm487_vm1 = vcmask 1043456  }
  0x36   :  { %142 = vst [vmem:[#allocation2 + $0x14] sm:$0x1] %v141_v50  ;;  %375 = vmatprep.subr.bf16.mxu0 %v1189_v0  ;;  %v1067_v50 = vld [vmem:[#allocation7 + $0x58] sm:$0xff]   ;;  %vm1361_vm4 = vmand %vm420_vm0, %vm72_vm2 }
  0x37   :  { %vm1378_vm5 = vmand %vm487_vm1, %vm72_vm2 }
  0x39   :  { %v1286_v52 = vld [vmem:[#allocation2 + $0x4] sm:$0xf]  ;;  %v1289_v53 = vld [vmem:[#allocation2] sm:$0xf]  ;;  %376 = vmatpush1.bf16.msra.mxu0 %v1063_v51 }
  0x3a   :  { %v147_v54 = vld [vmem:[#allocation2 + $0x8] sm:$0x1]  ;;  %v162_v55 = vshll.u32 %v1286_v52, 16  ;;  %v166_v56 = vshrl.u32 %v1286_v52, 16  ;;  %v153_v57 = vshrl.u32 %v1289_v53, 16  ;;  %v156_v58 = vshll.u32 %v1289_v53, 16  ;;  %377 = vmatprep.subr.bf16.mxu0 %v1189_v0 }
  0x3b   :  { %v172_v59 = vshll.u32 %v147_v54, 16  ;;  %v1295_v60 = vld [vmem:[#allocation2 + $0xc] sm:$0xf]  ;;  %v930_v62 = vcombine.low %v1289_v53, %v1286_v52  ;;  %v200_v24 = vld [vmem:[#allocation2] sm:$0xe]  ;;  %v213_v26 = vrot.slane %v1286_v52, 5 }
  0x3c   :  { %v164_v63 = vrot.slane %v162_v55, 5  ;;  %v168_v1 = vrot.slane %v166_v56, 4  ;;  %v1299_v2 = vld [vmem:[#allocation2 + $0x10] sm:$0xf]  ;;  %v177_v3 = vshrl.u32 %v1295_v60, 16  ;;  %v180_v4 = vshll.u32 %v1295_v60, 16 }
  0x3d   :  { %v155_v5 = vrot.slane %v153_v57, 4  ;;  %v158_v6 = vrot.slane %v156_v58, 5  ;;  %v174_v7 = vrot.slane %v172_v59, 5  ;;  %v148_v8 = vld [vmem:[#allocation2 + $0x14] sm:$0x1]  ;;  %v186_v9 = vshll.u32 %v1299_v2, 16  ;;  %378 = vmatpush1.bf16.msra.mxu0 %v1064_v61 }
  0x3e   :  { %v169_v10 = vor.u32 %v168_v1, %v164_v63  ;;  %v179_v11 = vrot.slane %v177_v3, 4  ;;  %v182_v12 = vrot.slane %v180_v4, 5  ;;  %v190_v13 = vshrl.u32 %v1299_v2, 16  ;;  %379 = vmatprep.subr.bf16.mxu0 %v1189_v0  ;;  %v201_v31 = vld [vmem:[#allocation2 + $0xc] sm:$0xe]  ;;  %v1068_v56 = vld [vmem:[#allocation7 + $0x50] sm:$0xff]  }
  0x3f   :  { %v159_v15 = vor.u32 %v158_v6, %v155_v5  ;;  %v188_v16 = vrot.slane %v186_v9, 5  ;;  %v196_v17 = vshll.u32 %v148_v8, 16  ;;  %v223_v18 = vrot.slane %v148_v8, 5  ;;  %v1069_v57 = vld [vmem:[#allocation7 + $0x48] sm:$0xff]   ;;  %v1070_v58 = vld [vmem:[#allocation7 + $0x40] sm:$0xff]   ;;  %v1073_v53 = vld [vmem:[#allocation9 + $0x38] sm:$0xff]  }
  0x40   :  { %v170_v19 = vrot.slane %v169_v10, 4  ;;  %v183_v20 = vor.u32 %v182_v12, %v179_v11  ;;  %v192_v21 = vrot.slane %v190_v13, 4  ;;  %v928_v29 = vrot.slane %v200_v24, 9  ;;  %v429_v3 = vld [vmem:[#allocation3 + $0x8] sm:$0x1]  ;;  %v1074_v4 = vld [vmem:[#allocation9 + $0x70] sm:$0xff]  }
  0x41   :  { %v160_v27 = vrot.slane %v159_v15, 4  ;;  %v198_v28 = vrot.slane %v196_v17, 5  ;;  %v216_v30 = vrot.slane %v147_v54, 5  ;;  %v215_v35 = vrot.slane %v213_v26, 4  ;;  %380 = vmatpush1.bf16.msra.mxu0 %v1065_v22  ;;  %v1075_v6 = vld [vmem:[#allocation9 + $0x30] sm:$0xff]   ;;  %v1077_v8 = vld [vmem:[#allocation9 + $0x28] sm:$0xff]  }
  0x42   :  { %v175_v32 = vsel %vm1308_vm14, %v170_v19, %v174_v7  ;;  %v184_v33 = vrot.slane %v183_v20, 4  ;;  %v193_v34 = vor.u32 %v192_v21, %v188_v16  ;;  %v214_v37 = vsel %vm1314_vm15, %v928_v29, %v213_v26  ;;  %381 = vmatprep.subr.bf16.mxu0 %v1189_v0  ;;  %v1076_v7 = vld [vmem:[#allocation9 + $0x68] sm:$0xff]   ;;  %v425_v9 = vld [vmem:[#allocation3 + $0xc] sm:$0x1]  ;;  %v1080_v15 = vld [vmem:[#allocation9 + $0x58] sm:$0xff]  }
  0x43   :  { %v165_v36 = vsel %vm1308_vm14, %v160_v27, %v164_v63  ;;  %v929_v38 = vrot.slane %v201_v31, 9  ;;  %v220_v39 = vrot.slane %v1299_v2, 5  ;;  %v217_v44 = vsel %vm1314_vm15, %v215_v35, %v216_v30  ;;  %v1078_v10 = vld [vmem:[#allocation9 + $0x60] sm:$0xff]   ;;  %v432_v13 = vld [vmem:[#allocation3 + $0x14] sm:$0x1]  ;;  %v1081_v17 = vld [vmem:[#allocation9 + $0x18] sm:$0xff]  }
  0x44   :  { %v932_v40 = vcombine.low %v165_v36, %v175_v32  ;;  %v189_v41 = vsel %vm1308_vm14, %v184_v33, %v188_v16  ;;  %v194_v42 = vrot.slane %v193_v34, 4  ;;  %v934_v45 = vcombine.low %v214_v37, %v217_v44  ;;  %v1079_v12 = vld [vmem:[#allocation9 + $0x20] sm:$0xff]   ;;  %v1083_v19 = vld [vmem:[#allocation9 + $0x10] sm:$0xff]   ;;  %v1084_v20 = vld [vmem:[#allocation9 + $0x48] sm:$0xff]  }
  0x45   :  { %v221_v46 = vsel %vm1314_vm15, %v929_v38, %v220_v39  ;;  %v222_v47 = vrot.slane %v220_v39, 4  ;;  %v931_v48 = vcombine.low %v1295_v60, %v1299_v2  ;;  %382 = vmatpush1.bf16.msra.mxu0 %v1066_v43  ;;  %v1072_v2 = vld [vmem:[#allocation9 + $0x78] sm:$0xff]   ;;  %v430_v5 = vsel %vm1361_vm4, 0, %v429_v3  ;;  %v1085_v21 = vld [vmem:[#allocation9 + $0x8] sm:$0xff]   ;;  %v1086_v22 = vld [vmem:[#allocation9 + $0x40] sm:$0xff]  }
  0x46   :  { %239 = vrot.lane.b32.xlu0 %v932_v40, %s1186_s23  ;;  %v199_v49 = vsel %vm1308_vm14, %v194_v42, %v198_v28  ;;  %949 = vmatprep.mubr.msk.bf16.mxu0 %vm249_vm13, %v934_v45  ;;  %431 = vst [vmem:[#allocation3 + $0x8] sm:$0x1] %v430_v5  ;;  %v426_v11 = vsel %vm1354_vm3, 0, %v425_v9  ;;  %v433_v16 = vsel %vm1361_vm4, 0, %v432_v13  ;;  %v1087_v24 = vld [vmem:[#allocation9] sm:$0xff]   ;;  %v1371_v26 = vld [vmem:[#allocation9 + $0xb8] sm:$0xff]  }
  0x47   :  { %v933_v51 = vcombine.low %v189_v41, %v199_v49  ;;  %v224_v54 = vsel %vm1314_vm15, %v222_v47, %v223_v18  ;;  %391 = vmatprep.subr.bf16.mxu0 %v1189_v0  ;;  %992 = vmatprep.subr.bf16.mxu1 %v1072_v2  ;;  %427 = vst [vmem:[#allocation3 + $0xc] sm:$0x1] %v426_v11  ;;  %434 = vst [vmem:[#allocation3 + $0x14] sm:$0x1] %v433_v16  ;;  %v1082_v18 = vld [vmem:[#allocation9 + $0x50] sm:$0xff]  }
  0x48   :  { %v935_v55 = vcombine.low %v221_v46, %v224_v54  ;;  %993 = vmatpush3.bf16.msra.mxu1 %v1073_v53  ;;  %v936_v27 = vld [vmem:[%s1419_s2] ss:$0 sm:$0xff] }
  0x49   :  { %392 = vmatpush2.bf16.msra.mxu0 %v1067_v50  ;;  %994 = vmatprep.subr.bf16.mxu1 %v1074_v4 }
  0x4a   :  { %241 = vrot.lane.b32.xlu0 %v933_v51, %s1186_s23  ;;  %393 = vmatprep.subr.bf16.mxu0 %v1189_v0 }
  0x4c   :  { %995 = vmatpush3.bf16.msra.mxu1 %v1075_v6 }
  0x4d   :  { %394 = vmatpush2.bf16.msra.mxu0 %v1068_v56  ;;  %996 = vmatprep.subr.bf16.mxu1 %v1076_v7  ;;  %v493_v56 = vld [vmem:[#allocation3 + $0x8] sm:$0x1] }
  0x4e   :  { %395 = vmatprep.subr.bf16.mxu0 %v1189_v0  ;;  %v496_v4 = vld [vmem:[#allocation3 + $0xc] sm:$0xf] }
  0x50   :  { %997 = vmatpush3.bf16.msra.mxu1 %v1077_v8 }
  0x51   :  { %396 = vmatpush2.bf16.msra.mxu0 %v1069_v57  ;;  %998 = vmatprep.subr.bf16.mxu1 %v1078_v10 }
  0x52   :  { %397 = vmatprep.subr.bf16.mxu0 %v1189_v0  ;;  %v422_v0 = vld [vmem:[#allocation3] sm:$0x1] }
  0x53   :  { %v423_v52 = vsel %vm1354_vm3, 0, %v422_v0 }
  0x54   :  { %424 = vst [vmem:[#allocation3] sm:$0x1] %v423_v52  ;;  %999 = vmatpush3.bf16.msra.mxu1 %v1079_v12  ;;  %v500_v12 = vld [vmem:[#allocation3 + $0x14] sm:$0x1] }
  0x55   :  { %398 = vmatpush2.bf16.msra.mxu0 %v1070_v58  ;;  %1000 = vmatprep.subr.bf16.mxu1 %v1080_v15 }
  0x58   :  { %1001 = vmatpush3.bf16.msra.mxu1 %v1081_v17 }
  0x59   :  { %1002 = vmatprep.subr.bf16.mxu1 %v1082_v18 }
  0x5b   :  { %v489_v44 = vld [vmem:[#allocation3] sm:$0xf] }
  0x5c   :  { %1003 = vmatpush3.bf16.msra.mxu1 %v1083_v19 }
  0x5d   :  { %1004 = vmatprep.subr.bf16.mxu1 %v1084_v20 }
  0x60   :  { %1005 = vmatpush3.bf16.msra.mxu1 %v1085_v21 }
  0x61   :  { %1006 = vmatprep.subr.bf16.mxu1 %v1086_v22 }
  0x64   :  { %1007 = vmatpush3.bf16.msra.mxu1 %v1087_v24 }
  0x65   :  { %1030 = vmatprep.subr.bf16.mxu1 %v1371_v26 }
  0xb8   :  { %v240_v59 = vpop.permute.xlu0 %239 }
  0xb9   :  { %v252_v60 = vsel %vm249_vm13, %v930_v62, %v240_v59 }
  0xba   :  { %400 = vmatmul.mubr.bf16.vlgmr.msra.gmra.mxu0 %v252_v60 }
  0xbb   :  { %950 = vmatprep.mubr.msk.bf16.mxu0 %vm249_vm13, %v935_v55 }
  0xbc   :  { %v242_v61 = vpop.permute.xlu0 %241 }
  0xbd   :  { %v256_v63 = vsel %vm249_vm13, %v931_v48, %v242_v61 }
  0xc2   :  { %408 = vmatmul.mubr.bf16.gmra.mxu0 %v256_v63 }
 0x17a   :  { %v401_v28 = vpop.f32.mrf.mxu0 }
 0x17b   :  { %v402_v29 = vadd.f32 %v936_v27, %v401_v28 }
 0x17c   :  { %v403_v30 = vpop.f32.mrf.mxu0 }
 0x17d   :  { %v416_v31 = vmax.f32 %v402_v29, 0.0 }
 0x17e   :  { %v404_v32 = vpop.f32.mrf.mxu0 }
 0x17f   :  { %v988_v33 = vpack.c.bf16 %v416_v31, %v416_v31  ;;  %v405_v34 = vadd.f32 %v936_v27, %v404_v32 }
 0x180   :  { %v406_v35 = vpop.f32.mrf.mxu0 }
 0x181   :  { %v448_v36 = vshrl.u32 %v988_v33, 16  ;;  %v417_v37 = vmax.f32 %v405_v34, 0.0  ;;  %v451_v40 = vshll.u32 %v988_v33, 16 }
 0x182   :  { %v409_v38 = vpop.f32.mrf.mxu0 }
 0x183   :  { %v450_v39 = vrot.slane %v448_v36, 7  ;;  %v989_v41 = vpack.c.bf16 %v417_v37, %v417_v37  ;;  %v410_v42 = vadd.f32 %v936_v27, %v409_v38 }
 0x184   :  { %v411_v45 = vpop.f32.mrf.mxu0 }
 0x185   :  { %v453_v46 = vor.u32 %v451_v40, %v450_v39  ;;  %v456_v47 = vshrl.u32 %v989_v41, 16  ;;  %v418_v48 = vmax.f32 %v410_v42, 0.0  ;;  %v459_v54 = vshll.u32 %v989_v41, 16 }
 0x186   :  { %v412_v49 = vpop.f32.mrf.mxu0  ;;  %v454_v59 = vrot.slane %v450_v39, 4 }
 0x187   :  { %v490_v50 = vsel %vm1378_vm5, %v453_v46, %v489_v44  ;;  %v458_v51 = vrot.slane %v456_v47, 7  ;;  %v413_v55 = vadd.f32 %v936_v27, %v412_v49  ;;  %v990_v57 = vpack.c.bf16 %v418_v48, %v418_v48 }
 0x188   :  { %491 = vst [vmem:[#allocation3] sm:$0xf] %v490_v50  ;;  %v414_v58 = vpop.f32.mrf.mxu0 }
 0x189   :  { %v461_v60 = vor.u32 %v459_v54, %v458_v51  ;;  %v463_v61 = vrot.slane %v458_v51, 4  ;;  %v419_v63 = vmax.f32 %v413_v55, 0.0  ;;  %v465_v0 = vshrl.u32 %v990_v57, 16  ;;  %v1090_v51 = vld [vmem:[#allocation9 + $0xb0] sm:$0xff]  }
 0x18a   :  { %v468_v2 = vshll.u32 %v990_v57, 16 }
 0x18b   :  { %v462_v52 = vsel %vm1260_vm7, %v454_v59, %v461_v60  ;;  %v494_v53 = vsel %vm1354_vm3, %v463_v61, %v493_v56  ;;  %v991_v62 = vpack.c.bf16 %v419_v63, %v419_v63  ;;  %v467_v3 = vrot.slane %v465_v0, 7 }
 0x18c   :  { %492 = vst [vmem:[#allocation3 + $0x4] sm:$0xf] %v462_v52  ;;  %495 = vst [vmem:[#allocation3 + $0x8] sm:$0x1] %v494_v53 }
 0x18d   :  { %v473_v5 = vshrl.u32 %v991_v62, 16  ;;  %v476_v6 = vshll.u32 %v991_v62, 16  ;;  %v470_v7 = vor.u32 %v468_v2, %v467_v3  ;;  %v471_v8 = vrot.slane %v467_v3, 4  ;;  %v1091_v2 = vld [vmem:[#allocation9 + $0xa8] sm:$0xff]  }
 0x18f   :  { %v475_v9 = vrot.slane %v473_v5, 7  ;;  %v503_v10 = vld [vmem:[#allocation3] sm:$0xf]  ;;  %v497_v11 = vsel %vm1378_vm5, %v470_v7, %v496_v4  ;;  %v1093_v5 = vld [vmem:[#allocation9 + $0xa0] sm:$0xff]   ;;  %v1095_v7 = vld [vmem:[#allocation9 + $0x90] sm:$0xff]  }
 0x190   :  { %v510_v13 = vshrl.u32 %v503_v10, 16  ;;  %v513_v15 = vshll.u32 %v503_v10, 16  ;;  %498 = vst [vmem:[#allocation3 + $0xc] sm:$0xf] %v497_v11  ;;  %v557_v60 = vld [vmem:[#allocation3] sm:$0xe] }
 0x191   :  { %v478_v16 = vor.u32 %v476_v6, %v475_v9  ;;  %v480_v17 = vrot.slane %v475_v9, 4  ;;  %v955_v62 = vrot.slane %v557_v60, 9  ;;  %v1097_v11 = vld [vmem:[#allocation9 + $0x80] sm:$0xff]  }
 0x192   :  { %v512_v18 = vrot.slane %v510_v13, 4  ;;  %v515_v19 = vrot.slane %v513_v15, 5 }
 0x193   :  { %v479_v20 = vsel %vm1260_vm7, %v471_v8, %v478_v16  ;;  %v501_v21 = vsel %vm1354_vm3, %v480_v17, %v500_v12  ;;  %v504_v22 = vld [vmem:[#allocation3 + $0x4] sm:$0xf]  ;;  %v507_v24 = vld [vmem:[#allocation3 + $0x8] sm:$0x1]  ;;  %v1096_v8 = vld [vmem:[#allocation9 + $0x88] sm:$0xff]  }
 0x194   :  { %499 = vst [vmem:[#allocation3 + $0x10] sm:$0xf] %v479_v20  ;;  %502 = vst [vmem:[#allocation3 + $0x14] sm:$0x1] %v501_v21  ;;  %v516_v27 = vor.u32 %v515_v19, %v512_v18  ;;  %v519_v28 = vshll.u32 %v504_v22, 16  ;;  %v523_v29 = vshrl.u32 %v504_v22, 16  ;;  %v957_v50 = vcombine.low %v503_v10, %v504_v22 }
 0x195   :  { %v529_v32 = vshll.u32 %v507_v24, 16  ;;  %v567_v39 = vrot.slane %v504_v22, 5  ;;  %v570_v61 = vrot.slane %v507_v24, 5 }
 0x196   :  { %v521_v30 = vrot.slane %v519_v28, 5  ;;  %v525_v31 = vrot.slane %v523_v29, 4  ;;  %v517_v33 = vrot.slane %v516_v27, 4 }
 0x197   :  { %v505_v35 = vld [vmem:[#allocation3 + $0xc] sm:$0xf]  ;;  %v531_v38 = vrot.slane %v529_v32, 5  ;;  %v569_v59 = vrot.slane %v567_v39, 4  ;;  %v963_v32 = vld [vmem:[%s1421_s4] ss:$0 sm:$0xff] }
 0x198   :  { %v526_v34 = vor.u32 %v525_v31, %v521_v30  ;;  %v534_v36 = vshrl.u32 %v505_v35, 16  ;;  %v537_v37 = vshll.u32 %v505_v35, 16  ;;  %v522_v1 = vsel %vm1308_vm14, %v517_v33, %v521_v30  ;;  %v558_v10 = vld [vmem:[#allocation3 + $0xc] sm:$0xe]  ;;  %s1158_s4 = scalar_lea.vmem %s916_s11, 512 }
 0x199   :  { %v571_v3 = vsel %vm1314_vm15, %v569_v59, %v570_v61  ;;  %v956_v13 = vrot.slane %v558_v10, 9  ;;  %p1159_p1 = scmp.ne.s32.totalorder %s916_s11, %s1158_s4  ;;  %p1164_p3 = scmp.lt.s32.totalorder %s1158_s4, %s1158_s4 }
 0x19a   :  { %v527_v23 = vrot.slane %v526_v34, 4  ;;  %v536_v42 = vrot.slane %v534_v36, 4  ;;  %v539_v43 = vrot.slane %v537_v37, 5 }
 0x19b   :  { %v506_v40 = vld [vmem:[#allocation3 + $0x10] sm:$0xf]  ;;  %v508_v41 = vld [vmem:[#allocation3 + $0x14] sm:$0x1]  ;;  %p1165_p4 = por %p1164_p3, %p1163_p2 }
 0x19c   :  { %v532_v44 = vsel %vm1308_vm14, %v527_v23, %v531_v38  ;;  %v543_v45 = vshll.u32 %v506_v40, 16  ;;  %v547_v46 = vshrl.u32 %v506_v40, 16  ;;  %v553_v47 = vshll.u32 %v508_v41, 16 }
 0x19d   :  { %v959_v48 = vcombine.low %v522_v1, %v532_v44  ;;  %v540_v49 = vor.u32 %v539_v43, %v536_v42  ;;  %v958_v53 = vcombine.low %v505_v35, %v506_v40  ;;  %v574_v9 = vrot.slane %v506_v40, 5  ;;  %p1166_p5 = pnand %p1165_p4, %p1159_p1 }
 0x19e   :  { %v545_v54 = vrot.slane %v543_v45, 5  ;;  %v549_v55 = vrot.slane %v547_v46, 4  ;;  %v555_v58 = vrot.slane %v553_v47, 5  ;;  %v577_v12 = vrot.slane %v508_v41, 5 }
 0x19f   :  { %836 = vmatprep.mubr.bf16.mxu1 %v959_v48  ;;  %v541_v56 = vrot.slane %v540_v49, 4  ;;  %v576_v15 = vrot.slane %v574_v9, 4  ;;  %v575_v16 = vsel %vm1314_vm15, %v956_v13, %v574_v9 }
 0x1a0   :  { %837 = vmatmul.mubr.bf16.vlgmr.msra.gmra.mxu1 %v957_v50  ;;  %v550_v57 = vor.u32 %v549_v55, %v545_v54 }
 0x1a1   :  { %1031 = vmatpush3.bf16.msra.mxu1 %v1371_v26  ;;  %v546_v63 = vsel %vm1308_vm14, %v541_v56, %v545_v54  ;;  %v568_v26 = vsel %vm1314_vm15, %v955_v62, %v567_v39  ;;  %v578_v17 = vsel %vm1314_vm15, %v576_v15, %v577_v12 }
 0x1a2   :  { %1032 = vmatprep.subr.bf16.mxu1 %v1090_v51  ;;  %v551_v0 = vrot.slane %v550_v57, 4  ;;  %v961_v6 = vcombine.low %v568_v26, %v571_v3  ;;  %v962_v18 = vcombine.low %v575_v16, %v578_v17 }
 0x1a4   :  { %v556_v52 = vsel %vm1308_vm14, %v551_v0, %v555_v58 }
 0x1a5   :  { %1033 = vmatpush3.bf16.msra.mxu1 %v1090_v51  ;;  %v960_v4 = vcombine.low %v546_v63, %v556_v52 }
 0x1a6   :  { %1034 = vmatprep.subr.bf16.mxu1 %v1091_v2 }
 0x1a7   :  { %844 = vmatprep.mubr.bf16.mxu1 %v960_v4 }
 0x1a8   :  { %845 = vmatmul.mubr.bf16.gmra.mxu1 %v958_v53 }
 0x1a9   :  { %1035 = vmatpush3.bf16.msra.mxu1 %v1091_v2  ;;  %1046 = vmatprep.mubr.bf16.mxu1 %v961_v6 }
 0x1aa   :  { %1036 = vmatprep.subr.bf16.mxu1 %v1093_v5 }
 0x1ad   :  { %1037 = vmatpush3.bf16.msra.mxu1 %v1093_v5 }
 0x1ae   :  { %1038 = vmatprep.subr.bf16.mxu1 %v1094_v14 }
 0x1b1   :  { %1039 = vmatpush3.bf16.msra.mxu1 %v1094_v14 }
 0x1b2   :  { %1040 = vmatprep.subr.bf16.mxu1 %v1095_v7 }
 0x1b5   :  { %1041 = vmatpush3.bf16.msra.mxu1 %v1095_v7 }
 0x1b6   :  { %1042 = vmatprep.subr.bf16.mxu1 %v1096_v8 }
 0x1b9   :  { %1043 = vmatpush3.bf16.msra.mxu1 %v1096_v8 }
 0x1ba   :  { %1044 = vmatprep.subr.bf16.mxu1 %v1097_v11 }
 0x1bd   :  { %1045 = vmatpush3.bf16.msra.mxu1 %v1097_v11 }
 0x1c0   :  { %1047 = vmatmul.mubr.bf16.vlgmr.msra.gmra.mxu1 %v962_v18 }
 0x260   :  { %v1008_v19 = vpop.f32.mrf.mxu1 }
 0x262   :  { %v1009_v20 = vpop.f32.mrf.mxu1 }
 0x263   :  { %v1010_v31 = vadd.f32 %v1009_v20, %v1008_v19 }
 0x264   :  { %v1011_v21 = vpop.f32.mrf.mxu1 }
 0x265   :  { %v839_v37 = vadd.f32 %v1010_v31, %v963_v32 }
 0x266   :  { %v1012_v22 = vpop.f32.mrf.mxu1 }
 0x267   :  { %v1013_v35 = vadd.f32 %v1012_v22, %v1011_v21 }
 0x268   :  { %v1014_v24 = vpop.f32.mrf.mxu1 }
 0x269   :  { %v842_v43 = vadd.f32 %v1013_v35, %v963_v32 }
 0x26a   :  { %v1015_v27 = vpop.f32.mrf.mxu1 }
 0x26b   :  { %v1016_v29 = vadd.f32 %v1015_v27, %v1014_v24 }
 0x26c   :  { %v1017_v28 = vpop.f32.mrf.mxu1 }
 0x26d   :  { %v847_v25 = vadd.f32 %v1016_v29, %v963_v32 }
 0x26e   :  { %v1018_v30 = vpop.f32.mrf.mxu1 }
 0x26f   :  { %v1019_v33 = vadd.f32 %v1018_v30, %v1017_v28 }
 0x271   :  { %v850_v1 = vadd.f32 %v1019_v33, %v963_v32 }
 0x280   :  { %v1048_v34 = vpop.f32.mrf.mxu1 }
 0x281   :  { %v896_v36 = vadd.f32 %v1048_v34, %v847_v25 }
 0x282   :  { %v887_v23 = vpop.f32.mrf.mxu1 }
 0x283   :  { %v904_v38 = vmax.f32 %v896_v36, 0.0  ;;  %v888_v39 = vadd.f32 %v887_v23, %v839_v37 }
 0x284   :  { %v1049_v40 = vpop.f32.mrf.mxu1 }
 0x285   :  { %908 = vst [vmem:[#allocation10 + $0x10] sm:$0xff] %v904_v38  ;;  %v902_v41 = vmax.f32 %v888_v39, 0.0  ;;  %v899_v42 = vadd.f32 %v1049_v40, %v850_v1 }
 0x286   :  { %v890_v44 = vpop.f32.mrf.mxu1 }
 0x287   :  { %906 = vst [vmem:[#allocation10] sm:$0xff] %v902_v41  ;;  %v905_v45 = vmax.f32 %v899_v42, 0.0  ;;  %v891_v46 = vadd.f32 %v890_v44, %v842_v43 }
 0x289   :  { %909 = vst [vmem:[#allocation10 + $0x18] sm:$0xff] %v905_v45  ;;  %v903_v47 = vmax.f32 %v891_v46, 0.0 }
 0x28b   :  { %907 = vst [vmem:[#allocation10 + $0x8] sm:$0xff] %v903_v47 }
 0x28c   :  { %1169 = shalt.err (!%p1166_p5)
}
 0x28d   :  { %s1191_s12 = smov 128   ;;  %s1192_s13 = smov 8  }
 0x28e   :  { %921 = dma.vmem_to_hbm [thread:$0]  %s916_s11, 512, %s1422_s5, [#allocation6], %s1191_s12, %s1191_s12, %s1192_s13  }
 0x28f   :  { %1182 = dma.done.wait [#allocation6], 512  }
 0x290   :  { %1183 = vsyncadd [#allocation6], 4294966784 }
 0x291   :  { %925 = vsyncpa [#allocation5], 1 }
 0x292   :  { %926 = vsyncpa [#allocation8], 1 }
 0x293   :  { %927 = vsyncpa [#allocation6], 1 }

</bundles_post_ra>
